<compile_context>
chip_gen: v7x
topology: tpu7x:2x2x1
jax: 0.10.0
libtpu: 0.0.40
codegen_flags: <defaults>
</compile_context>

<pallas_src>
import jax
import jax.numpy as jnp
from jax.experimental import pallas as pl
from jax.experimental.pallas import tpu as pltpu

_LANE = 128
_SUBLANE = 8


def _round_up(x, m):
    return ((x + m - 1) // m) * m


def _vmem_capacity_bytes():
    """Physical VMEM of the current TPU generation (fallback: v7x's 64 MiB per TC)."""
    try:
        info = pltpu.get_tpu_info()
        cap = int(getattr(info, "vmem_capacity_bytes", 0))
        if cap > 0:
            return cap
    except Exception:
        pass
    return 64 * 1024 * 1024


def _divisor_tile(dim_p, cap):
    """Largest multiple of 128 that divides dim_p (itself a multiple of 128) and <= cap."""
    if dim_p <= cap:
        return dim_p
    best = _LANE
    t = 2 * _LANE
    while t <= cap:
        if dim_p % t == 0:
            best = t
        t += _LANE
    return best


def _fc_kernel(x_ref, w_ref, b_ref, o_ref):
    # x_ref: (tm, tk)   w_ref: (tk, tn)  (weight pre-transposed to (F, C))
    # b_ref: (1, tn) f32   o_ref: (tm, tn) f32 -- doubles as the accumulator:
    # the output block index is independent of k, so it stays resident in VMEM
    # across the whole reduction axis (classic P3, without a scratch buffer).
    @pl.when(pl.program_id(2) == 0)
    def _():
        o_ref[...] = jnp.broadcast_to(b_ref[...], o_ref.shape)

    o_ref[...] += jnp.dot(
        x_ref[...], w_ref[...], preferred_element_type=jnp.float32
    )


def prepare_params(weight, bias):
    """One-time parameter prep: transpose W to (F, C) and pad to lane alignment.

    weight: (C, F) float32 (PyTorch Linear layout), bias: (C,) float32.
    Returns (w_t_pad, b_pad) with shapes (Fp, Cp) and (1, Cp), Fp/Cp lane-aligned.
    """
    C, F = weight.shape
    Fp = _round_up(F, _LANE)
    Cp = _round_up(C, _LANE)
    w_t = weight.T.astype(jnp.float32)
    if (Fp, Cp) != (F, C):
        w_t = jnp.pad(w_t, ((0, Fp - F), (0, Cp - C)))
    b2 = bias.astype(jnp.float32).reshape(1, C)
    if Cp != C:
        b2 = jnp.pad(b2, ((0, 0), (0, Cp - C)))
    return w_t, b2


def fc_forward_prepared(x, w_t_pad, b_pad, num_classes, *,
                        tile_m=None, tile_n=None, tile_k=None, use_bf16=False):
    """y = x @ W.T + b using a pre-transposed / pre-padded weight (Fp, Cp)."""
    N, F = x.shape
    Fp0, Cp0 = w_t_pad.shape
    C = num_classes
    assert Fp0 == _round_up(F, _LANE), "prepared weight does not match x feature dim"
    assert Cp0 == _round_up(C, _LANE), "prepared bias/weight does not match num_classes"
    out_dtype = x.dtype

    # ---- generation-aware tile caps --------------------------------------
    vmem_cap = _vmem_capacity_bytes()
    big_vmem = vmem_cap >= 100 * 1024 * 1024      # v5e/v6e: 128 MiB; v7x: 64 MiB/TC
    max_tm = 512
    max_tn = 2048 if big_vmem else 1024
    max_tk = 2048 if big_vmem else 1024

    m_align = 16 if use_bf16 else _SUBLANE        # bf16 packs 16 rows per sublane pair

    if tile_m is None:
        tile_m = min(max_tm, _round_up(N, m_align))
    else:
        tile_m = _round_up(tile_m, m_align)

    if tile_k is None:
        # Divisor of the aligned F -> x is never padded along K beyond lane alignment.
        tile_k = _divisor_tile(Fp0, max_tk)
    else:
        tile_k = _round_up(tile_k, _LANE)

    if tile_n is None:
        tile_n = _divisor_tile(Cp0, max_tn)
        # Megacore (2-TC) friendliness: with a single M block, make sure the parallel
        # N axis has >= 2 blocks so the second TensorCore has work.
        if (_round_up(N, tile_m) // tile_m == 1
                and Cp0 >= 2 * _LANE and Cp0 // tile_n == 1):
            tile_n = _divisor_tile(Cp0, max(Cp0 // 2, _LANE))
    else:
        tile_n = _round_up(tile_n, _LANE)

    Np = _round_up(N, tile_m)
    Fp = _round_up(Fp0, tile_k)
    Cp = _round_up(Cp0, tile_n)

    # Re-pad parameters only if user-supplied tiles don't divide the aligned dims.
    if (Fp, Cp) != (Fp0, Cp0):
        w_t_pad = jnp.pad(w_t_pad, ((0, Fp - Fp0), (0, Cp - Cp0)))
        b_pad = jnp.pad(b_pad, ((0, 0), (0, Cp - Cp0)))

    # Pad x for M-tile / lane alignment (zeros along K contribute nothing to the dot).
    if (Np, Fp) != (N, F):
        x = jnp.pad(x, ((0, Np - N), (0, Fp - F)))

    x_in = x.astype(jnp.bfloat16) if use_bf16 else x.astype(jnp.float32)
    w_in = w_t_pad.astype(jnp.bfloat16) if use_bf16 else w_t_pad

    grid = (Np // tile_m, Cp // tile_n, Fp // tile_k)
    gi, gj, gk = grid

    x_b = jnp.dtype(x_in.dtype).itemsize
    w_b = jnp.dtype(w_in.dtype).itemsize

    # HBM traffic including re-streaming: x is re-read per N block, W^T per M block.
    cost = pl.CostEstimate(
        flops=2 * Np * Fp * Cp,
        transcendentals=0,
        bytes_accessed=int(gj * Np * Fp * x_b + gi * Fp * Cp * w_b
                           + Cp * 4 + Np * Cp * 4),
    )

    # Working set: double-buffered x / W^T / bias tiles + double-buffered f32 out block.
    need = (2 * tile_m * tile_k * x_b
            + 2 * tile_k * tile_n * w_b
            + 2 * tile_n * 4
            + 2 * tile_m * tile_n * 4)
    vmem_limit = int(min(int(0.75 * vmem_cap),                 # headroom for Mosaic scratch
                         max(int(1.5 * need) + (1 << 20), 8 * 1024 * 1024)))

    out = pl.pallas_call(
        _fc_kernel,
        out_shape=jax.ShapeDtypeStruct((Np, Cp), jnp.float32),
        grid_spec=pltpu.PrefetchScalarGridSpec(
            num_scalar_prefetch=0,
            grid=grid,
            in_specs=[
                pl.BlockSpec((tile_m, tile_k), lambda i, j, k: (i, k)),   # x tile
                pl.BlockSpec((tile_k, tile_n), lambda i, j, k: (k, j)),   # W^T tile
                pl.BlockSpec((1, tile_n), lambda i, j, k: (0, j)),        # bias tile
            ],
            out_specs=pl.BlockSpec((tile_m, tile_n), lambda i, j, k: (i, j)),
        ),
        compiler_params=pltpu.CompilerParams(
            dimension_semantics=("parallel", "parallel", "arbitrary"),
            vmem_limit_bytes=vmem_limit,
        ),
        cost_estimate=cost,
    )(x_in, w_in, b_pad)

    out = out[:N, :C]
    if out.dtype != out_dtype:
        out = out.astype(out_dtype)
    return out


def fc_forward(x, weight, bias, **kwargs):
    """Convenience wrapper (pays transpose/pad per call; prefer FCPallas for reuse)."""
    w_t_pad, b_pad = prepare_params(weight, bias)
    return fc_forward_prepared(x, w_t_pad, b_pad, weight.shape[0], **kwargs)


class FCPallas:
    """Mirror of the PyTorch FC module: Linear(dim_feature, num_classes) with weight
    and bias zero-initialized. Parameter transpose/pad is cached at init."""

    def __init__(self, dim_feature, num_classes):
        self.num_classes = num_classes
        self.dim_feature = dim_feature
        self.weight = jnp.zeros((num_classes, dim_feature), jnp.float32)
        self.bias = jnp.zeros((num_classes,), jnp.float32)
        self._w_t_pad, self._b_pad = prepare_params(self.weight, self.bias)

    def __call__(self, x):
        return fc_forward_prepared(x, self._w_t_pad, self._b_pad, self.num_classes)


if __name__ == "__main__":
    key = jax.random.PRNGKey(0)

    # ---- 1) Exact module semantics at the module's toy shapes ----
    batch, dim_feature, num_classes = 8, 32, 16
    kx, kw, kb, kx2, kw2, kb2, kx4, kw4, kb4, kx5, kw5, kb5 = jax.random.split(key, 12)
    x = jax.random.normal(kx, (batch, dim_feature), jnp.float32)

    model = FCPallas(dim_feature, num_classes)
    y_zero = jax.block_until_ready(model(x))
    assert y_zero.shape == (batch, num_classes)
    assert jnp.allclose(y_zero, 0.0), "zero-init FC must produce zeros"

    # ---- 2) Kernel math vs reference with non-trivial weights ----
    w = jax.random.normal(kw, (num_classes, dim_feature), jnp.float32) * 0.1
    b = jax.random.normal(kb, (num_classes,), jnp.float32) * 0.1
    y = jax.block_until_ready(fc_forward(x, w, b))
    y_ref = x @ w.T + b
    assert jnp.allclose(y, y_ref, atol=1e-5, rtol=1e-5), "kernel mismatch vs reference"

    # ---- 3) Exercise a tiled/padded multi-step grid with explicit small tiles ----
    N2, F2_, C2 = 40, 384, 200
    x2 = jax.random.normal(kx2, (N2, F2_), jnp.float32)
    w2 = jax.random.normal(kw2, (C2, F2_), jnp.float32) * 0.05
    b2 = jax.random.normal(kb2, (C2,), jnp.float32) * 0.05
    y2 = jax.block_until_ready(
        fc_forward(x2, w2, b2, tile_m=16, tile_n=128, tile_k=128)
    )
    y2_ref = x2 @ w2.T + b2
    assert y2.shape == (N2, C2)
    assert jnp.allclose(y2, y2_ref, atol=1e-4, rtol=1e-4), "tiled kernel mismatch"

    # ---- 4) Default (auto) tile selection on a larger problem ----
    N4, F4, C4 = 256, 1536, 768
    x4 = jax.random.normal(kx4, (N4, F4), jnp.float32)
    w4 = jax.random.normal(kw4, (C4, F4), jnp.float32) * 0.03
    b4 = jax.random.normal(kb4, (C4,), jnp.float32) * 0.03
    y4 = jax.block_until_ready(fc_forward(x4, w4, b4))
    y4_ref = jnp.dot(x4, w4.T, precision=jax.lax.Precision.HIGHEST) + b4
    assert y4.shape == (N4, C4)
    assert jnp.allclose(y4, y4_ref, atol=3e-2, rtol=3e-2), "auto-tiled kernel mismatch"

    # ---- 5) Optional bf16 MXU path (f32 accumulation) ----
    N5, F5, C5 = 64, 256, 256
    x5 = jax.random.normal(kx5, (N5, F5), jnp.float32)
    w5 = jax.random.normal(kw5, (C5, F5), jnp.float32) * 0.05
    b5 = jax.random.normal(kb5, (C5,), jnp.float32) * 0.05
    y5 = jax.block_until_ready(fc_forward(x5, w5, b5, use_bf16=True))
    y5_ref = x5 @ w5.T + b5
    assert jnp.allclose(y5, y5_ref, atol=5e-2, rtol=5e-2), "bf16 kernel mismatch"

    print("KERNEL_OK")
</pallas_src>

<mosaic_0001>
module attributes {stable_mosaic.version = 11 : i64} {
  func.func @_fc_kernel(%arg0: i32, %arg1: i32, %arg2: i32, %arg3: memref<8x128xf32, #tpu.memory_space<vmem>>, %arg4: memref<128x128xf32, #tpu.memory_space<vmem>>, %arg5: memref<1x128xf32, #tpu.memory_space<vmem>>, %arg6: memref<8x128xf32, #tpu.memory_space<vmem>>) attributes {dimension_semantics = [#tpu.dimension_semantics<parallel>, #tpu.dimension_semantics<parallel>, #tpu.dimension_semantics<arbitrary>], iteration_bounds = array<i64: 1, 1, 1>, scalar_prefetch = 0 : i64, scratch_operands = 0 : i64, tpu.core_type = #tpu.core_type<tc>, window_params = [{transform_indices = @transform_0, window_bounds = array<i64: 8, 128>}, {transform_indices = @transform_1, window_bounds = array<i64: 128, 128>}, {transform_indices = @transform_2, window_bounds = array<i64: 1, 128>}, {transform_indices = @transform_3, window_bounds = array<i64: 8, 128>}]} {
    %c0_i32 = arith.constant 0 : i32
    %0 = arith.cmpi eq, %arg2, %c0_i32 : i32
    %1 = arith.extui %0 : i1 to i32
    %c0_i32_0 = arith.constant 0 : i32
    %2 = arith.cmpi ne, %1, %c0_i32_0 : i32
    scf.if %2 {
      %c0_8 = arith.constant 0 : index
      %c0_9 = arith.constant 0 : index
      %9 = vector.load %arg5[%c0_8, %c0_9] : memref<1x128xf32, #tpu.memory_space<vmem>>, vector<1x128xf32>
      %10 = vector.shape_cast %9 : vector<1x128xf32> to vector<1x128xf32>
      %11 = vector.broadcast %10 : vector<1x128xf32> to vector<8x128xf32>
      %c0_10 = arith.constant 0 : index
      %c0_11 = arith.constant 0 : index
      %12 = vector.load %arg6[%c0_10, %c0_11] : memref<8x128xf32, #tpu.memory_space<vmem>>, vector<8x128xf32>
      tpu.vector_store %arg6[%c0_10, %c0_11], %11 {strides = array<i32>} : memref<8x128xf32, #tpu.memory_space<vmem>>, vector<8x128xf32>,
    } else {
    }
    %c0 = arith.constant 0 : index
    %c0_1 = arith.constant 0 : index
    %3 = vector.load %arg6[%c0, %c0_1] : memref<8x128xf32, #tpu.memory_space<vmem>>, vector<8x128xf32>
    %c0_2 = arith.constant 0 : index
    %c0_3 = arith.constant 0 : index
    %4 = vector.load %arg3[%c0_2, %c0_3] : memref<8x128xf32, #tpu.memory_space<vmem>>, vector<8x128xf32>
    %c0_4 = arith.constant 0 : index
    %c0_5 = arith.constant 0 : index
    %5 = vector.load %arg4[%c0_4, %c0_5] : memref<128x128xf32, #tpu.memory_space<vmem>>, vector<128x128xf32>
    %cst = arith.constant dense<0.000000e+00> : vector<8x128xf32>
    %6 = tpu.matmul %4, %5, %cst {dimension_numbers = #tpu.dot_dimension_numbers<[1], [0], [0], [1], [0, 0, 1, 1], [], []>} : vector<8x128xf32>, vector<128x128xf32>, vector<8x128xf32> -> vector<8x128xf32>
    %7 = arith.addf %3, %6 : vector<8x128xf32>
    %c0_6 = arith.constant 0 : index
    %c0_7 = arith.constant 0 : index
    %8 = vector.load %arg6[%c0_6, %c0_7] : memref<8x128xf32, #tpu.memory_space<vmem>>, vector<8x128xf32>
    tpu.vector_store %arg6[%c0_6, %c0_7], %7 {strides = array<i32>} : memref<8x128xf32, #tpu.memory_space<vmem>>, vector<8x128xf32>,
    return
  }
  func.func @transform_0(%arg0: i32, %arg1: i32, %arg2: i32) -> (i32, i32) {
    %c0_i32 = arith.constant 0 : i32
    return %arg0, %arg2 : i32, i32
  }
  func.func @transform_1(%arg0: i32, %arg1: i32, %arg2: i32) -> (i32, i32) {
    %c0_i32 = arith.constant 0 : i32
    return %arg2, %arg1 : i32, i32
  }
  func.func @transform_2(%arg0: i32, %arg1: i32, %arg2: i32) -> (i32, i32) {
    %c0_i32 = arith.constant 0 : i32
    %c0_i32_0 = arith.constant 0 : i32
    return %c0_i32, %arg1 : i32, i32
  }
  func.func @transform_3(%arg0: i32, %arg1: i32, %arg2: i32) -> (i32, i32) {
    %c0_i32 = arith.constant 0 : i32
    return %arg0, %arg1 : i32, i32
  }
}

</mosaic_0001>

<bundles_post_ra>
// kernel: tpu_custom_call.1
= control target key start
LH: loop header
LB: loop body
LE: loop exit
PB: predicated region body
PF: predicated region fallthrough
CT: control target
= control target key end

     0   :  { %8 = vsyncpa [#allocation3], 0  ;;  %s390_s0 = inlined_call_operand.hbm [shape: f32[8,128], index: 0, kind: input, shape index: {}]   ;;  %s391_s1 = inlined_call_operand.hbm [shape: f32[128,128], index: 1, kind: input, shape index: {}]   ;;  %s392_s2 = inlined_call_operand.vmem [shape: f32[1,128], index: 2, kind: input, shape index: {}]   ;;  %s393_s3 = inlined_call_operand.hbm [shape: f32[8,128], index: 3, kind: output, shape index: {}]  }
   0x1   :  { %9 = vsyncpa [#allocation6], 0 }
   0x2   :  { %10 = vsyncpa [#allocation4], 0  ;;  %s316_s12 = smov [#allocation2]   ;;  %s317_s14 = smov [#allocation5]  }
   0x3   :  { %s17_s13 = sshll.u32 %s316_s12, 4  ;;  %s26_s15 = sshll.u32 %s317_s14, 4  ;;  %s18_s13 = int_to_ptr.vmem [resolvable:$true] %s17_s13  ;;  %s344_s15 = int_to_ptr.vmem [resolvable:$true] %s26_s15 }
   0x4   :  { %s244_s18 = scalar_lea.hbm %s390_s0, 128 }
   0x5   :  { %p245_p0 = scmp.ne.s32.totalorder %s390_s0, %s244_s18  ;;  %p248_p1 = scmp.lt.u32.totalorder %s244_s18, %s390_s0 }
   0x7   :  { %p250_p2 = pnand %p248_p1, %p245_p0 }
   0x9   :  { %253 = shalt.err (!%p250_p2)
}
   0xa   :  { %s254_s23 = scalar_lea.vmem %s18_s13, 128  ;;  %p259_p4 = scmp.lt.s32.totalorder %s18_s13, %s18_s13 }
   0xb   :  { %p255_p3 = scmp.ne.s32.totalorder %s18_s13, %s254_s23  ;;  %p260_p5 = scmp.lt.s32.totalorder %s254_s23, %s254_s23 }
   0xd   :  { %p261_p6 = por %p260_p5, %p259_p4 }
   0xf   :  { %p262_p7 = pnand %p261_p6, %p255_p3 }
  0x11   :  { %265 = shalt.err (!%p262_p7)
}
  0x12   :  { %20 = dma.hbm_to_vmem [thread:$0]  %s390_s0, 128, %s18_s13, [#allocation3]  }
  0x13   :  { %s266_s28 = scalar_lea.hbm %s391_s1, 2048 }
  0x14   :  { %p267_p8 = scmp.ne.s32.totalorder %s391_s1, %s266_s28  ;;  %p270_p9 = scmp.lt.u32.totalorder %s266_s28, %s391_s1 }
  0x16   :  { %p272_p10 = pnand %p270_p9, %p267_p8 }
  0x18   :  { %275 = shalt.err (!%p272_p10)
}
  0x19   :  { %s276_s6 = scalar_lea.vmem %s344_s15, 2048  ;;  %p281_p12 = scmp.lt.s32.totalorder %s344_s15, %s344_s15 }
  0x1a   :  { %p277_p11 = scmp.ne.s32.totalorder %s344_s15, %s276_s6  ;;  %p282_p13 = scmp.lt.s32.totalorder %s276_s6, %s276_s6 }
  0x1c   :  { %p283_p0 = por %p282_p13, %p281_p12 }
  0x1e   :  { %p284_p1 = pnand %p283_p0, %p277_p11 }
  0x20   :  { %287 = shalt.err (!%p284_p1)
}
  0x21   :  { %s318_s0 = smov 128   ;;  %s319_s7 = smov 8  }
  0x22   :  { %32 = dma.hbm_to_vmem [thread:$0]  %s391_s1, 2048, %s344_s15, [#allocation6], %s318_s0, %s318_s0, %s319_s7  }
  0x23   :  { %310 = dma.done.wait [#allocation3], 128  }
  0x24   :  { %311 = vsyncadd [#allocation3], 4294967168 }
  0x25   :  { %312 = dma.done.wait [#allocation6], 2048  }
  0x26   :  { %313 = vsyncadd [#allocation6], 4294965248  ;;  %v320_v0 = vmov 0.0|0.0   ;;  %vm321_vm0 = vmmov 0   ;;  %v322_v1 = vmov 0.0   ;;  %v55_v2 = vld [vmem:[#allocation5] sm:$0xff] }
  0x27   :  { %212 = vmatprep.subr.bf16.mxu0 %v320_v0  ;;  %209 = vmatprep.mubr.msk.f32.mxu0 %vm321_vm0, %v322_v1  ;;  %v56_v3 = vld [vmem:[#allocation5 + $0x8] sm:$0xff]  ;;  %v57_v4 = vld [vmem:[#allocation5 + $0x10] sm:$0xff]  ;;  %v58_v6 = vld [vmem:[#allocation5 + $0x18] sm:$0xff]  ;;  %s323_s11 = smov [#allocation7]  }
  0x28   :  { %v213_v5 = vpack.c.bf16 %v56_v3, %v55_v2  ;;  %v216_v7 = vpack.c.bf16 %v58_v6, %v57_v4  ;;  %v59_v8 = vld [vmem:[#allocation5 + $0x20] sm:$0xff]  ;;  %v60_v9 = vld [vmem:[#allocation5 + $0x28] sm:$0xff]  ;;  %v61_v11 = vld [vmem:[#allocation5 + $0x30] sm:$0xff]  ;;  %s149_s12 = sshll.u32 %s323_s11, 4  ;;  %s150_s12 = int_to_ptr.vmem [resolvable:$true] %s149_s12 }
  0x29   :  { %v219_v10 = vpack.c.bf16 %v60_v9, %v59_v8  ;;  %v62_v12 = vld [vmem:[#allocation5 + $0x38] sm:$0xff]  ;;  %v63_v14 = vld [vmem:[#allocation5 + $0x40] sm:$0xff]  ;;  %v64_v15 = vld [vmem:[#allocation5 + $0x48] sm:$0xff]  ;;  %s288_s13 = scalar_lea.vmem %s150_s12, 128  ;;  %p293_p3 = scmp.lt.s32.totalorder %s150_s12, %s150_s12 }
  0x2a   :  { %214 = vmatpush3.bf16.msra.mxu0 %v213_v5  ;;  %v222_v13 = vpack.c.bf16 %v62_v12, %v61_v11  ;;  %v225_v16 = vpack.c.bf16 %v64_v15, %v63_v14  ;;  %v65_v17 = vld [vmem:[#allocation5 + $0x50] sm:$0xff]  ;;  %v66_v18 = vld [vmem:[#allocation5 + $0x58] sm:$0xff]  ;;  %v67_v20 = vld [vmem:[#allocation5 + $0x60] sm:$0xff]  ;;  %p289_p2 = scmp.ne.s32.totalorder %s150_s12, %s288_s13  ;;  %p294_p4 = scmp.lt.s32.totalorder %s288_s13, %s288_s13 }
  0x2b   :  { %215 = vmatprep.subr.bf16.mxu0 %v320_v0  ;;  %v228_v19 = vpack.c.bf16 %v66_v18, %v65_v17  ;;  %v68_v21 = vld [vmem:[#allocation5 + $0x68] sm:$0xff]  ;;  %v69_v23 = vld [vmem:[#allocation5 + $0x70] sm:$0xff]  ;;  %v70_v24 = vld [vmem:[#allocation5 + $0x78] sm:$0xff] }
  0x2c   :  { %v231_v22 = vpack.c.bf16 %v68_v21, %v67_v20  ;;  %v234_v25 = vpack.c.bf16 %v70_v24, %v69_v23  ;;  %v54_v26 = vld [vmem:[#allocation2] sm:$0xff]  ;;  %p295_p5 = por %p294_p4, %p293_p3 }
  0x2d   :  { %v159_v27 = vld [vmem:[%s392_s2] ss:$0 sm:$0xff] }
  0x2e   :  { %217 = vmatpush3.bf16.msra.mxu0 %v216_v7  ;;  %p296_p6 = pnand %p295_p5, %p289_p2 }
  0x2f   :  { %218 = vmatprep.subr.bf16.mxu0 %v320_v0 }
  0x32   :  { %220 = vmatpush3.bf16.msra.mxu0 %v219_v10 }
  0x33   :  { %221 = vmatprep.subr.bf16.mxu0 %v320_v0 }
  0x36   :  { %223 = vmatpush3.bf16.msra.mxu0 %v222_v13 }
  0x37   :  { %224 = vmatprep.subr.bf16.mxu0 %v320_v0 }
  0x3a   :  { %226 = vmatpush3.bf16.msra.mxu0 %v225_v16 }
  0x3b   :  { %227 = vmatprep.subr.bf16.mxu0 %v320_v0 }
  0x3e   :  { %229 = vmatpush3.bf16.msra.mxu0 %v228_v19 }
  0x3f   :  { %230 = vmatprep.subr.bf16.mxu0 %v320_v0 }
  0x42   :  { %232 = vmatpush3.bf16.msra.mxu0 %v231_v22 }
  0x43   :  { %233 = vmatprep.subr.bf16.mxu0 %v320_v0 }
  0x46   :  { %235 = vmatpush3.bf16.msra.mxu0 %v234_v25 }
  0x49   :  { %210 = vmatmul.mubr.f32.vlgmr.msra.gmra.mrb[0].mxu0 %v54_v26 }
 0x11c   :  { %v137_v28 = vpop.f32.mrb[0].mxu0 }
 0x11d   :  { %v141_v29 = vadd.f32 %v159_v27, %v137_v28  ;;  %v211_v30 = vpop.f32.mrb[1].mxu0 }
 0x11f   :  { %142 = vst [vmem:[#allocation7] sm:$0xff] %v141_v29 }
 0x120   :  { %299 = shalt.err (!%p296_p6)
}
 0x121   :  { %s300_s16 = scalar_lea.hbm %s393_s3, 128 }
 0x122   :  { %p301_p7 = scmp.ne.s32.totalorder %s393_s3, %s300_s16  ;;  %p304_p8 = scmp.lt.u32.totalorder %s300_s16, %s393_s3 }
 0x124   :  { %p306_p9 = pnand %p304_p8, %p301_p7 }
 0x126   :  { %309 = shalt.err (!%p306_p9)
}
 0x127   :  { %152 = dma.vmem_to_hbm [thread:$0]  %s150_s12, 128, %s393_s3, [#allocation4]  }
 0x128   :  { %314 = dma.done.wait [#allocation4], 128  }
 0x129   :  { %315 = vsyncadd [#allocation4], 4294967168 }
 0x12a   :  { %156 = vsyncpa [#allocation3], 1 }
 0x12b   :  { %157 = vsyncpa [#allocation6], 1 }
 0x12c   :  { %158 = vsyncpa [#allocation4], 1 }

</bundles_post_ra>
